<compile_context>
chip_gen: v7x
topology: tpu7x:2x2x1
jax: 0.10.0
libtpu: 0.0.40
codegen_flags: <defaults>
</compile_context>

<pallas_src>
import jax
import jax.numpy as jnp
from jax.experimental import pallas as pl
from jax.experimental.pallas import tpu as pltpu


def _vmem_capacity_bytes():
    """Per-core VMEM capacity; falls back to the v7x 64 MiB worst case."""
    try:
        cap = getattr(pltpu.get_tpu_info(), "vmem_capacity_bytes", None)
        if cap:
            return int(cap)
    except Exception:
        pass
    return 64 * 1024 * 1024


def _block_vmem_bytes(b_tile, t_out, t_in, hidden, itemsize):
    """Rough per-grid-step VMEM footprint: double-buffered I/O blocks plus the
    live f32 intermediates of the kernel body."""
    io = itemsize * b_tile * (2 * t_out * hidden        # q block + ctx block
                              + t_in * hidden           # encoder block
                              + t_out * t_in)           # attn block
    wgt = itemsize * (2 * hidden * hidden + hidden)     # weight + bias
    live_f32 = 4 * b_tile * (3 * t_out * t_in           # s / p / attn
                             + 3 * t_out * hidden       # q, ctx, proj
                             + t_in * hidden)           # transposed enc tile
    return 2 * (io + wgt) + live_f32


def _pick_b_tile(batch, t_out, t_in, hidden, itemsize, vmem_budget,
                 target_rows=256):
    """Pick the batch tile.  Constraints / preferences:
      * second-minor block dim must be a multiple of 8 or the full batch,
      * the per-step footprint must fit the VMEM budget,
      * prefer an even multi-step grid (v7x megacore), then enough packed rows
        (b_tile * t_out) to feed the MXU, then fewer grid steps."""
    cands = [d for d in range(1, batch + 1)
             if batch % d == 0 and (d % 8 == 0 or d == batch)]
    fitting = [d for d in cands
               if _block_vmem_bytes(d, t_out, t_in, hidden, itemsize) <= vmem_budget]
    if not fitting:
        fitting = [min(cands)]

    def score(d):
        steps = batch // d
        even_multi = 1 if (steps >= 2 and steps % 2 == 0) else 0
        return (even_multi, min(d * t_out, target_rows), -steps)

    return max(fitting, key=score)


def _make_attention_kernel(hidden, mm_dtype):
    def kernel(out_ref, enc_ref, w_ref, b_ref, ctx_ref, attn_ref):
        # out_ref : (T_out, Bt, H)     time-major decoder output block
        # enc_ref : (T_in,  Bt, H)     time-major encoder output block
        # w_ref   : (2H, H)            linear_out weight, pre-transposed (x @ W)
        # b_ref   : (1, H)             linear_out bias
        # ctx_ref : (T_out, Bt, H)     tanh(linear_out(cat(context, output)))
        # attn_ref: (Bt, T_out, T_in)  softmax attention weights
        t_out, bt, _ = out_ref.shape

        # Batch-major views of the small VMEM tiles.  Swapping the two leading
        # (non-lane) axes is a cheap sublane shuffle, not a lane transpose.
        q = jnp.transpose(out_ref[...], (1, 0, 2))       # (Bt, To, H)
        e = jnp.transpose(enc_ref[...], (1, 0, 2))       # (Bt, Ti, H)
        q_mm = q.astype(mm_dtype)
        e_mm = e.astype(mm_dtype)

        # scores: contract the H dims directly (no e^T materialization).
        s = jnp.einsum("bqd,bkd->bqk", q_mm, e_mm,
                       preferred_element_type=jnp.float32)   # (Bt, To, Ti) f32

        # numerically stable softmax over input_len, all math in f32
        m = jnp.max(s, axis=-1, keepdims=True)
        p = jnp.exp(s - m)
        denom = jnp.sum(p, axis=-1, keepdims=True)
        # EUP vrcp (otherwise-idle slot) + two Newton steps -> ~f32 exact.
        r = pl.reciprocal(denom, approx=True)
        r = r * (2.0 - denom * r)
        r = r * (2.0 - denom * r)
        attn = p * r                                          # (Bt, To, Ti) f32
        attn_ref[...] = attn.astype(attn_ref.dtype)

        # context = attn @ enc  (default path reuses the exact f32 attn;
        # bf16 path casts it for the MXU and accumulates in f32)
        ctx = jnp.einsum("bqk,bkd->bqd", attn.astype(mm_dtype), e_mm,
                         preferred_element_type=jnp.float32)  # (Bt, To, H) f32

        # projection: tanh(cat(context, output) @ W^T + b).  The concat is
        # avoided by splitting the pre-transposed weight into its context and
        # output halves; all Bt*T_out rows are packed into single MXU matmuls.
        rows = bt * t_out
        ctx2 = ctx.reshape(rows, hidden).astype(mm_dtype)
        q2 = q_mm.reshape(rows, hidden)
        w_ctx = w_ref[pl.ds(0, hidden), :]                    # (H, H)
        w_out = w_ref[pl.ds(hidden, hidden), :]               # (H, H)
        proj = (jnp.dot(ctx2, w_ctx, preferred_element_type=jnp.float32)
                + jnp.dot(q2, w_out, preferred_element_type=jnp.float32)
                + b_ref[...].astype(jnp.float32))
        out = jnp.tanh(proj).reshape(bt, t_out, hidden)
        # store back time-major (sublane shuffle again)
        ctx_ref[...] = jnp.transpose(out, (1, 0, 2)).astype(ctx_ref.dtype)

    return kernel


def attention_forward(output_tbh, encoder_outputs_tbh, weight, bias,
                      *, matmul_dtype=None):
    """output_tbh: [T_out, B, H], encoder_outputs_tbh: [T_in, B, H]
       weight: [H, 2H] (torch Linear layout), bias: [H]
       matmul_dtype: optional dtype (e.g. jnp.bfloat16) for the MXU matmuls;
         accumulation and softmax math stay in f32.  None -> input dtype.
       returns (context [T_out, B, H], attn [B, T_out, T_in])."""
    t_out, batch, hidden = output_tbh.shape
    t_in = encoder_outputs_tbh.shape[0]
    dtype = output_tbh.dtype
    itemsize = jnp.dtype(dtype).itemsize
    mm_dtype = jnp.dtype(matmul_dtype) if matmul_dtype is not None else jnp.dtype(dtype)

    # weight pre-transposed so the kernel computes x @ W; cast once here when
    # the bf16 matmul path is requested (halves its per-step HBM traffic).
    # (Constant blocks are small; single-buffering them via pl.Buffered(1) is a
    #  possible further VMEM saving for very large H.)
    w_t = weight.T.astype(mm_dtype)          # [2H, H]
    b2d = bias.reshape(1, hidden)            # [1, H]

    vmem_cap = _vmem_capacity_bytes()
    b_tile = _pick_b_tile(batch, t_out, t_in, hidden, itemsize,
                          vmem_budget=int(0.75 * vmem_cap))
    grid = (batch // b_tile,)

    est = _block_vmem_bytes(b_tile, t_out, t_in, hidden, itemsize)
    vmem_limit = int(min(0.9 * vmem_cap, max(2 * est, 32 * 1024 * 1024)))
    vmem_limit = max(vmem_limit, est)

    flops = int(2 * batch * t_out * t_in * hidden * 2            # scores + ctx
                + 2 * batch * t_out * 2 * hidden * hidden)       # projection
    transcendentals = int(batch * t_out * t_in + batch * t_out * hidden)
    w_bytes = 2 * hidden * hidden * jnp.dtype(mm_dtype).itemsize + hidden * itemsize
    bytes_accessed = int(itemsize * (2 * batch * t_out * hidden  # q in + ctx out
                                     + batch * t_in * hidden     # enc in
                                     + batch * t_out * t_in)     # attn out
                         + grid[0] * w_bytes)                    # weight reloads

    kernel = _make_attention_kernel(hidden, mm_dtype)

    ctx_tbh, attn = pl.pallas_call(
        kernel,
        out_shape=(
            jax.ShapeDtypeStruct((t_out, batch, hidden), dtype),
            jax.ShapeDtypeStruct((batch, t_out, t_in), dtype),
        ),
        grid_spec=pltpu.PrefetchScalarGridSpec(
            num_scalar_prefetch=0,
            grid=grid,
            in_specs=[
                pl.BlockSpec((t_out, b_tile, hidden), lambda i: (0, i, 0)),
                pl.BlockSpec((t_in, b_tile, hidden), lambda i: (0, i, 0)),
                pl.BlockSpec((2 * hidden, hidden), lambda i: (0, 0)),
                pl.BlockSpec((1, hidden), lambda i: (0, 0)),
            ],
            out_specs=[
                pl.BlockSpec((t_out, b_tile, hidden), lambda i: (0, i, 0)),
                pl.BlockSpec((b_tile, t_out, t_in), lambda i: (i, 0, 0)),
            ],
        ),
        compiler_params=pltpu.CompilerParams(
            dimension_semantics=("parallel",),
            vmem_limit_bytes=vmem_limit),
        cost_estimate=pl.CostEstimate(
            flops=flops,
            transcendentals=transcendentals,
            bytes_accessed=bytes_accessed),
    )(output_tbh, encoder_outputs_tbh, w_t, b2d)

    return ctx_tbh, attn


def _reference(output_tbh, enc_tbh, weight, bias):
    # pure-JAX reference mirroring the PyTorch code (lengths=None path)
    q = jnp.transpose(output_tbh, (1, 0, 2))        # [B, T_out, H]
    e = jnp.transpose(enc_tbh, (1, 0, 2))           # [B, T_in, H]
    scores = jnp.einsum("bth,bsh->bts", q, e)
    attn = jax.nn.softmax(scores, axis=-1)
    ctx = jnp.einsum("bts,bsh->bth", attn, e)
    combined = jnp.concatenate([ctx, q], axis=-1)   # [B, T_out, 2H]
    proj = jnp.tanh(combined @ weight.T + bias)
    return jnp.transpose(proj, (1, 0, 2)), attn


if __name__ == "__main__":
    # True-f32 matmuls everywhere so the Pallas kernel and the XLA reference
    # agree tightly for the default (non-bf16) path.
    jax.config.update("jax_default_matmul_precision", "highest")

    key = jax.random.PRNGKey(0)
    batch, t_out, t_in, hidden = 2, 4, 8, 32

    k1, k2, k3, k4 = jax.random.split(key, 4)
    output = jax.random.normal(k1, (t_out, batch, hidden), dtype=jnp.float32)
    encoder_outputs = jax.random.normal(k2, (t_in, batch, hidden), dtype=jnp.float32)
    # deterministic "init_linear_wt": small normal weights, small bias
    weight = 0.02 * jax.random.normal(k3, (hidden, 2 * hidden), dtype=jnp.float32)
    bias = 0.02 * jax.random.normal(k4, (hidden,), dtype=jnp.float32)

    context, attn = attention_forward(output, encoder_outputs, weight, bias)
    jax.block_until_ready((context, attn))

    ref_ctx, ref_attn = _reference(output, encoder_outputs, weight, bias)
    assert context.shape == (t_out, batch, hidden)
    assert attn.shape == (batch, t_out, t_in)
    assert jnp.allclose(context, ref_ctx, atol=2e-4, rtol=2e-4), \
        float(jnp.max(jnp.abs(context - ref_ctx)))
    assert jnp.allclose(attn, ref_attn, atol=2e-4, rtol=2e-4), \
        float(jnp.max(jnp.abs(attn - ref_attn)))

    # bf16 MXU path (f32 accumulation / softmax) -- looser tolerance.
    ctx_bf, attn_bf = attention_forward(output, encoder_outputs, weight, bias,
                                        matmul_dtype=jnp.bfloat16)
    jax.block_until_ready((ctx_bf, attn_bf))
    assert jnp.allclose(ctx_bf, ref_ctx, atol=1e-1, rtol=1e-1), \
        float(jnp.max(jnp.abs(ctx_bf - ref_ctx)))
    assert jnp.allclose(attn_bf, ref_attn, atol=1e-1, rtol=1e-1), \
        float(jnp.max(jnp.abs(attn_bf - ref_attn)))

    print("KERNEL_OK")
</pallas_src>

<mosaic_0001>
module attributes {stable_mosaic.version = 11 : i64} {
  func.func @kernel(%arg0: i32, %arg1: memref<4x2x32xf32, #tpu.memory_space<vmem>>, %arg2: memref<8x2x32xf32, #tpu.memory_space<vmem>>, %arg3: memref<64x32xf32, #tpu.memory_space<vmem>>, %arg4: memref<1x32xf32, #tpu.memory_space<vmem>>, %arg5: memref<4x2x32xf32, #tpu.memory_space<vmem>>, %arg6: memref<2x4x8xf32, #tpu.memory_space<vmem>>) attributes {dimension_semantics = [#tpu.dimension_semantics<parallel>], iteration_bounds = array<i64: 1>, scalar_prefetch = 0 : i64, scratch_operands = 0 : i64, tpu.core_type = #tpu.core_type<tc>, window_params = [{transform_indices = @transform_0, window_bounds = array<i64: 4, 2, 32>}, {transform_indices = @transform_1, window_bounds = array<i64: 8, 2, 32>}, {pipeline_mode = #tpu.pipeline_mode<synchronous>, transform_indices = @transform_2, window_bounds = array<i64: 64, 32>}, {pipeline_mode = #tpu.pipeline_mode<synchronous>, transform_indices = @transform_3, window_bounds = array<i64: 1, 32>}, {transform_indices = @transform_4, window_bounds = array<i64: 4, 2, 32>}, {transform_indices = @transform_5, window_bounds = array<i64: 2, 4, 8>}]} {
    %c0 = arith.constant 0 : index
    %c0_0 = arith.constant 0 : index
    %c0_1 = arith.constant 0 : index
    %0 = vector.load %arg1[%c0, %c0_0, %c0_1] : memref<4x2x32xf32, #tpu.memory_space<vmem>>, vector<4x2x32xf32>
    %1 = tpu.transpose %0, [1, 0, 2] : vector<4x2x32xf32> -> vector<2x4x32xf32>
    %c0_2 = arith.constant 0 : index
    %c0_3 = arith.constant 0 : index
    %c0_4 = arith.constant 0 : index
    %2 = vector.load %arg2[%c0_2, %c0_3, %c0_4] : memref<8x2x32xf32, #tpu.memory_space<vmem>>, vector<8x2x32xf32>
    %3 = tpu.transpose %2, [1, 0, 2] : vector<8x2x32xf32> -> vector<2x8x32xf32>
    "tpu.trace_start"() <{level = 10 : i32, message = "bqd,bkd->bqk"}> : () -> ()
    %cst = arith.constant dense<0.000000e+00> : vector<2x4x8xf32>
    %4 = tpu.matmul %1, %3, %cst {dimension_numbers = #tpu.dot_dimension_numbers<[2], [2], [1], [1], [0, 0, 0, 1, 1, 1], [0], [0]>, precision = #tpu.contract_precision<fp32>} : vector<2x4x32xf32>, vector<2x8x32xf32>, vector<2x4x8xf32> -> vector<2x4x8xf32>
    "tpu.trace_stop"() : () -> ()
    %cst_5 = arith.constant dense<0xFF800000> : vector<2x4xf32>
    %5 = vector.multi_reduction <maximumf>, %4, %cst_5 [2] : vector<2x4x8xf32> to vector<2x4xf32>
    %6 = vector.shape_cast %5 : vector<2x4xf32> to vector<2x4x1xf32>
    %7 = vector.broadcast %6 : vector<2x4x1xf32> to vector<2x4x8xf32>
    %8 = arith.subf %4, %7 : vector<2x4x8xf32>
    %9 = math.exp %8 : vector<2x4x8xf32>
    %cst_6 = arith.constant dense<0.000000e+00> : vector<2x4xf32>
    %10 = vector.multi_reduction <add>, %9, %cst_6 [2] : vector<2x4x8xf32> to vector<2x4xf32>
    %11 = vector.shape_cast %10 : vector<2x4xf32> to vector<2x4x1xf32>
    %12 = tpu.reciprocal %11 {approx = true} : vector<2x4x1xf32> -> vector<2x4x1xf32>
    %13 = arith.mulf %11, %12 : vector<2x4x1xf32>
    %cst_7 = arith.constant 2.000000e+00 : f32
    %14 = vector.broadcast %cst_7 : f32 to vector<2x4x1xf32>
    %15 = arith.subf %14, %13 : vector<2x4x1xf32>
    %16 = arith.mulf %12, %15 : vector<2x4x1xf32>
    %17 = arith.mulf %11, %16 : vector<2x4x1xf32>
    %cst_8 = arith.constant 2.000000e+00 : f32
    %18 = vector.broadcast %cst_8 : f32 to vector<2x4x1xf32>
    %19 = arith.subf %18, %17 : vector<2x4x1xf32>
    %20 = arith.mulf %16, %19 : vector<2x4x1xf32>
    %21 = vector.broadcast %20 : vector<2x4x1xf32> to vector<2x4x8xf32>
    %22 = arith.mulf %9, %21 : vector<2x4x8xf32>
    %c0_9 = arith.constant 0 : index
    %c0_10 = arith.constant 0 : index
    %c0_11 = arith.constant 0 : index
    %23 = vector.load %arg6[%c0_9, %c0_10, %c0_11] : memref<2x4x8xf32, #tpu.memory_space<vmem>>, vector<2x4x8xf32>
    tpu.vector_store %arg6[%c0_9, %c0_10, %c0_11], %22 {strides = array<i32>} : memref<2x4x8xf32, #tpu.memory_space<vmem>>, vector<2x4x8xf32>,
    "tpu.trace_start"() <{level = 10 : i32, message = "bqk,bkd->bqd"}> : () -> ()
    %cst_12 = arith.constant dense<0.000000e+00> : vector<2x4x32xf32>
    %24 = tpu.matmul %22, %3, %cst_12 {dimension_numbers = #tpu.dot_dimension_numbers<[2], [1], [1], [2], [0, 0, 0, 1, 1, 2], [0], [0]>, precision = #tpu.contract_precision<fp32>} : vector<2x4x8xf32>, vector<2x8x32xf32>, vector<2x4x32xf32> -> vector<2x4x32xf32>
    "tpu.trace_stop"() : () -> ()
    %25 = vector.shape_cast %24 : vector<2x4x32xf32> to vector<8x32xf32>
    %26 = vector.shape_cast %1 : vector<2x4x32xf32> to vector<8x32xf32>
    %c0_13 = arith.constant 0 : index
    %c0_14 = arith.constant 0 : index
    %27 = vector.load %arg3[%c0_13, %c0_14] : memref<64x32xf32, #tpu.memory_space<vmem>>, vector<32x32xf32>
    %c32 = arith.constant 32 : index
    %c0_15 = arith.constant 0 : index
    %28 = vector.load %arg3[%c32, %c0_15] : memref<64x32xf32, #tpu.memory_space<vmem>>, vector<32x32xf32>
    %cst_16 = arith.constant dense<0.000000e+00> : vector<8x32xf32>
    %29 = tpu.matmul %25, %27, %cst_16 {dimension_numbers = #tpu.dot_dimension_numbers<[1], [0], [0], [1], [0, 0, 1, 1], [], []>, precision = #tpu.contract_precision<fp32>} : vector<8x32xf32>, vector<32x32xf32>, vector<8x32xf32> -> vector<8x32xf32>
    %cst_17 = arith.constant dense<0.000000e+00> : vector<8x32xf32>
    %30 = tpu.matmul %26, %28, %cst_17 {dimension_numbers = #tpu.dot_dimension_numbers<[1], [0], [0], [1], [0, 0, 1, 1], [], []>, precision = #tpu.contract_precision<fp32>} : vector<8x32xf32>, vector<32x32xf32>, vector<8x32xf32> -> vector<8x32xf32>
    %31 = arith.addf %29, %30 : vector<8x32xf32>
    %c0_18 = arith.constant 0 : index
    %c0_19 = arith.constant 0 : index
    %32 = vector.load %arg4[%c0_18, %c0_19] : memref<1x32xf32, #tpu.memory_space<vmem>>, vector<1x32xf32>
    %33 = vector.broadcast %32 : vector<1x32xf32> to vector<8x32xf32>
    %34 = arith.addf %31, %33 : vector<8x32xf32>
    %35 = math.tanh %34 : vector<8x32xf32>
    %36 = vector.shape_cast %35 : vector<8x32xf32> to vector<2x4x32xf32>
    %37 = tpu.transpose %36, [1, 0, 2] : vector<2x4x32xf32> -> vector<4x2x32xf32>
    %c0_20 = arith.constant 0 : index
    %c0_21 = arith.constant 0 : index
    %c0_22 = arith.constant 0 : index
    %38 = vector.load %arg5[%c0_20, %c0_21, %c0_22] : memref<4x2x32xf32, #tpu.memory_space<vmem>>, vector<4x2x32xf32>
    tpu.vector_store %arg5[%c0_20, %c0_21, %c0_22], %37 {strides = array<i32>} : memref<4x2x32xf32, #tpu.memory_space<vmem>>, vector<4x2x32xf32>,
    return
  }
  func.func @transform_0(%arg0: i32) -> (i32, i32, i32) {
    %c0_i32 = arith.constant 0 : i32
    %c0_i32_0 = arith.constant 0 : i32
    %c0_i32_1 = arith.constant 0 : i32
    return %c0_i32, %arg0, %c0_i32_0 : i32, i32, i32
  }
  func.func @transform_1(%arg0: i32) -> (i32, i32, i32) {
    %c0_i32 = arith.constant 0 : i32
    %c0_i32_0 = arith.constant 0 : i32
    %c0_i32_1 = arith.constant 0 : i32
    return %c0_i32, %arg0, %c0_i32_0 : i32, i32, i32
  }
  func.func @transform_2(%arg0: i32) -> (i32, i32) {
    %c0_i32 = arith.constant 0 : i32
    %c0_i32_0 = arith.constant 0 : i32
    %c0_i32_1 = arith.constant 0 : i32
    return %c0_i32, %c0_i32_0 : i32, i32
  }
  func.func @transform_3(%arg0: i32) -> (i32, i32) {
    %c0_i32 = arith.constant 0 : i32
    %c0_i32_0 = arith.constant 0 : i32
    %c0_i32_1 = arith.constant 0 : i32
    return %c0_i32, %c0_i32_0 : i32, i32
  }
  func.func @transform_4(%arg0: i32) -> (i32, i32, i32) {
    %c0_i32 = arith.constant 0 : i32
    %c0_i32_0 = arith.constant 0 : i32
    %c0_i32_1 = arith.constant 0 : i32
    return %c0_i32, %arg0, %c0_i32_0 : i32, i32, i32
  }
  func.func @transform_5(%arg0: i32) -> (i32, i32, i32) {
    %c0_i32 = arith.constant 0 : i32
    %c0_i32_0 = arith.constant 0 : i32
    %c0_i32_1 = arith.constant 0 : i32
    return %arg0, %c0_i32, %c0_i32_0 : i32, i32, i32
  }
}

</mosaic_0001>

<bundles_post_ra>
// kernel: tpu_custom_call.1
= control target key start
LH: loop header
LB: loop body
LE: loop exit
PB: predicated region body
PF: predicated region fallthrough
CT: control target
= control target key end

     0   :  { %11 = vsyncpa [#allocation3], 0  ;;  %v29_v0 = vlaneseq  ;;  %v3570_v1 = vmov 0.0   ;;  %v3571_v2 = vmov 1983009808   ;;  %vm3573_vm0 = vmmov 0   ;;  %s3890_s0 = inlined_call_operand.vmem [shape: f32[4,2,32], index: 0, kind: input, shape index: {}]   ;;  %s3891_s1 = inlined_call_operand.vmem [shape: f32[8,2,32], index: 1, kind: input, shape index: {}]   ;;  %s3892_s2 = inlined_call_operand.vmem [shape: f32[64,32], index: 2, kind: input, shape index: {}]   ;;  %s3893_s3 = inlined_call_operand.vmem [shape: f32[1,32], index: 3, kind: input, shape index: {}]   ;;  %s3894_s4 = inlined_call_operand.hbm [shape: f32[4,2,32], index: 4, kind: output, shape index: {0}]   ;;  %s3895_s5 = inlined_call_operand.hbm [shape: f32[2,4,8], index: 5, kind: output, shape index: {1}]  }
   0x1   :  { %3125 = vmatprep.subr.mxu0 %v3570_v1  ;;  %v27_v3 = vunpack.c.l.s4 %v3571_v2  ;;  %v3572_v4 = vmov 1934713408   ;;  %3155 = vmatprep.subr.mxu1 %v3570_v1  ;;  %v3516_v9 = vld.sshfl [vmem:[%s3891_s1] sm:$0xf pattern:$0x76325410] }
   0x2   :  { %v43_v5 = vunpack.c.l.s4 %v3572_v4  ;;  %v30_v6 = vshrl.u32 %v29_v0, 7  ;;  %v3517_v10 = vld.sshfl [vmem:[%s3891_s1 + $0x2] sm:$0xf pattern:$0x76325410]  ;;  %3127 = vmatprep.mubr.msk.f32.mxu0 %vm3573_vm0, %v3570_v1  ;;  %3157 = vmatprep.mubr.msk.f32.mxu1 %vm3573_vm0, %v3570_v1 }
   0x3   :  { %v28_v7 = vunpack.c.0.s8 %v27_v3  ;;  %v3518_v11 = vld.sshfl [vmem:[%s3891_s1 + $0x8] sm:$0xf pattern:$0x76325410] }
   0x4   :  { %v44_v8 = vunpack.c.0.s8 %v43_v5  ;;  %v3519_v13 = vld.sshfl [vmem:[%s3891_s1 + $0xa] sm:$0xf pattern:$0x76325410] }
   0x5   :  { %v3622_v12 = vsub.s32 %v28_v7, %v30_v6  ;;  %v3520_v14 = vld.sshfl [vmem:[%s3890_s0] sm:$0xf pattern:$0x76325410] }
   0x6   :  { %v3521_v15 = vld.sshfl [vmem:[%s3890_s0 + $0x2] sm:$0xf pattern:$0x76325410] }
   0x7   :  { %12 = vsyncpa [#allocation5], 0  ;;  %v3637_v16 = vsub.s32 %v44_v8, %v30_v6  ;;  %v90_v17 = vcombine.low %v3516_v9, %v3517_v10  ;;  %v98_v18 = vcombine.low %v3518_v11, %v3519_v13  ;;  %v41_v21 = vcombine.low %v3520_v14, %v3521_v15 }
   0x8   :  { %vm108_vm1 = vcmask 261120   ;;  %vm1013_vm2 = vcmask 60416   ;;  %vm1050_vm3 = vcmask 64512  }
   0x9   :  { %v97_v19 = vrot.slane %v90_v17, %v3637_v16  ;;  %v105_v20 = vrot.slane %v98_v18, %v3637_v16  ;;  %v3646_v24 = vrot.slane %v41_v21, %v3637_v16 }
   0xb   :  { %v3641_v22 = vcombine.low %v97_v19, %v105_v20  ;;  %v3643_v23 = vcombine.high %v97_v19, %v105_v20  ;;  %v110_v27 = vsel %vm108_vm1, %v3646_v24, 0  ;;  %v3656_v28 = vcombine.high %v3646_v24, %v3570_v1 }
   0xc   :  { %v181_v31 = vand.u32 4294901760, %v110_v27 }
   0xd   :  { %v113_v25 = vsel %vm108_vm1, %v3641_v22, 0  ;;  %v565_v26 = vsel %vm108_vm1, %v3643_v23, 0  ;;  %v562_v32 = vsel %vm108_vm1, %v3656_v28, 0  ;;  %v3701_v3 = vand.u32 4294901760, %v3641_v22 }
   0xe   :  { %v116_v29 = vand.u32 4294901760, %v113_v25  ;;  %v568_v30 = vand.u32 4294901760, %v565_v26  ;;  %v182_v35 = vsub.f32 %v110_v27, %v181_v31  ;;  %v633_v36 = vand.u32 4294901760, %v562_v32 }
   0xf   :  { %v3706_v4 = vand.u32 4294901760, %v3643_v23  ;;  %v1132_v21 = vsub.f32 %v3641_v22, %v3701_v3 }
  0x10   :  { %3126 = vmatpush3.xpose.msra.mxu0 %v116_v29  ;;  %v193_v33 = vsub.f32 %v113_v25, %v116_v29  ;;  %3156 = vmatpush3.xpose.msra.mxu1 %v568_v30  ;;  %v645_v34 = vsub.f32 %v565_v26, %v568_v30  ;;  %v183_v37 = vand.u32 4294901760, %v182_v35  ;;  %v634_v39 = vsub.f32 %v562_v32, %v633_v36 }
  0x11   :  { %3130 = vmatprep.subr.mxu0 %v3570_v1  ;;  %3160 = vmatprep.subr.mxu1 %v3570_v1 }
  0x12   :  { %v194_v38 = vand.u32 4294901760, %v193_v33  ;;  %v646_v40 = vand.u32 4294901760, %v645_v34  ;;  %v184_v41 = vsub.f32 %v182_v35, %v183_v37  ;;  %v635_v43 = vand.u32 4294901760, %v634_v39 }
  0x14   :  { %v195_v42 = vsub.f32 %v193_v33, %v194_v38  ;;  %v647_v44 = vsub.f32 %v645_v34, %v646_v40  ;;  %v185_v45 = vand.u32 4294901760, %v184_v41  ;;  %v636_v47 = vsub.f32 %v634_v39, %v635_v43 }
  0x16   :  { %v196_v46 = vand.u32 4294901760, %v195_v42  ;;  %v648_v48 = vand.u32 4294901760, %v647_v44  ;;  %3128 = vmatmul.mubr.f32.vlgmr.msra.gmra.mrb[0].mxu0 %v185_v45  ;;  %v637_v49 = vand.u32 4294901760, %v636_v47  ;;  %v1953_v47 = vld [vmem:[%s3892_s2 + $0x20] sm:$0xff] }
  0x17   :  { %3132 = vmatprep.mubr.msk.f32.mxu0 %vm3573_vm0, %v3570_v1 }
  0x18   :  { %3131 = vmatpush3.xpose.msra.mxu0 %v196_v46  ;;  %3158 = vmatmul.mubr.f32.vlgmr.msra.gmra.mrb[0].mxu1 %v637_v49  ;;  %v1961_v49 = vand.u32 4294901760, %v1953_v47 }
  0x19   :  { %3135 = vmatprep.subr.mxu0 %v3570_v1  ;;  %3161 = vmatpush3.xpose.msra.mxu1 %v648_v48  ;;  %v1954_v48 = vld [vmem:[%s3892_s2 + $0x28] sm:$0xff] }
  0x1a   :  { %3162 = vmatprep.mubr.msk.f32.mxu1 %vm3573_vm0, %v3570_v1  ;;  %3165 = vmatprep.subr.mxu1 %v3570_v1 }
  0x1e   :  { %3133 = vmatmul.mubr.f32.vlgmr.msra.gmra.mrb[0].mxu0 %v181_v31 }
  0x1f   :  { %3136 = vmatpush3.xpose.msra.mxu0 %v193_v33  ;;  %3137 = vmatprep.mubr.msk.f32.mxu0 %vm3573_vm0, %v3570_v1 }
  0x20   :  { %3163 = vmatmul.mubr.f32.vlgmr.msra.gmra.mrb[0].mxu1 %v633_v36  ;;  %3140 = vmatprep.subr.mxu0 %v3570_v1 }
  0x21   :  { %3166 = vmatpush3.xpose.msra.mxu1 %v645_v34  ;;  %3167 = vmatprep.mubr.msk.f32.mxu1 %vm3573_vm0, %v3570_v1 }
  0x22   :  { %3170 = vmatprep.subr.mxu1 %v3570_v1 }
  0x26   :  { %3138 = vmatmul.mubr.f32.vlgmr.msra.gmra.mrb[0].mxu0 %v182_v35 }
  0x27   :  { %3141 = vmatpush3.xpose.msra.mxu0 %v116_v29  ;;  %3142 = vmatprep.mubr.msk.f32.mxu0 %vm3573_vm0, %v3570_v1 }
  0x28   :  { %3168 = vmatmul.mubr.f32.vlgmr.msra.gmra.mrb[0].mxu1 %v634_v39  ;;  %3145 = vmatprep.subr.mxu0 %v3570_v1 }
  0x29   :  { %3171 = vmatpush3.xpose.msra.mxu1 %v568_v30  ;;  %3172 = vmatprep.mubr.msk.f32.mxu1 %vm3573_vm0, %v3570_v1 }
  0x2a   :  { %3175 = vmatprep.subr.mxu1 %v3570_v1 }
  0x2e   :  { %3143 = vmatmul.mubr.f32.vlgmr.msra.gmra.mrb[0].mxu0 %v183_v37 }
  0x2f   :  { %3146 = vmatpush3.xpose.msra.mxu0 %v194_v38  ;;  %3147 = vmatprep.mubr.msk.f32.mxu0 %vm3573_vm0, %v3570_v1 }
  0x30   :  { %3173 = vmatmul.mubr.f32.vlgmr.msra.gmra.mrb[0].mxu1 %v635_v43  ;;  %3150 = vmatprep.subr.mxu0 %v3570_v1 }
  0x31   :  { %3176 = vmatpush3.xpose.msra.mxu1 %v646_v40  ;;  %3177 = vmatprep.mubr.msk.f32.mxu1 %vm3573_vm0, %v3570_v1 }
  0x32   :  { %3180 = vmatprep.subr.mxu1 %v3570_v1 }
  0x36   :  { %3148 = vmatmul.mubr.f32.vlgmr.msra.gmra.mrb[0].mxu0 %v181_v31 }
  0x37   :  { %3151 = vmatpush3.xpose.msra.mxu0 %v116_v29  ;;  %3152 = vmatprep.mubr.msk.f32.mxu0 %vm3573_vm0, %v3570_v1 }
  0x38   :  { %3178 = vmatmul.mubr.f32.vlgmr.msra.gmra.mrb[0].mxu1 %v633_v36  ;;  %3185 = vmatprep.subr.mxu0 %v3570_v1 }
  0x39   :  { %3181 = vmatpush3.xpose.msra.mxu1 %v568_v30  ;;  %3182 = vmatprep.mubr.msk.f32.mxu1 %vm3573_vm0, %v3570_v1  ;;  %v1133_v30 = vand.u32 4294901760, %v1132_v21 }
  0x3a   :  { %3215 = vmatprep.subr.mxu1 %v3570_v1 }
  0x3b   :  { %v1134_v22 = vsub.f32 %v1132_v21, %v1133_v30 }
  0x3d   :  { %v1135_v41 = vand.u32 4294901760, %v1134_v22 }
  0x3e   :  { %3153 = vmatmul.mubr.f32.vlgmr.msra.gmra.mrb[0].mxu0 %v181_v31  ;;  %v1581_v31 = vsub.f32 %v3643_v23, %v3706_v4 }
  0x3f   :  { %3187 = vmatprep.mubr.msk.f32.mxu0 %vm3573_vm0, %v3570_v1  ;;  %3186 = vmatpush3.msra.mxu0 %v3701_v3 }
  0x40   :  { %3183 = vmatmul.mubr.f32.vlgmr.msra.gmra.mrb[0].mxu1 %v633_v36  ;;  %3190 = vmatprep.subr.mxu0 %v3570_v1  ;;  %v1582_v36 = vand.u32 4294901760, %v1581_v31 }
  0x41   :  { %3217 = vmatprep.mubr.msk.f32.mxu1 %vm3573_vm0, %v3570_v1  ;;  %3216 = vmatpush3.msra.mxu1 %v3706_v4 }
  0x42   :  { %3220 = vmatprep.subr.mxu1 %v3570_v1  ;;  %v1583_v42 = vsub.f32 %v1581_v31, %v1582_v36 }
  0x44   :  { %v1584_v45 = vand.u32 4294901760, %v1583_v42 }
 0x111   :  { %v557_v50 = vpop.f32.mrb[0].mxu0 }
 0x112   :  { %v3154_v51 = vpop.f32.mrb[1].mxu0  ;;  %v1014_v52 = vsel %vm1013_vm2, %v557_v50, -inf }
 0x113   :  { %1015 = vmax.xlane.f32.xlu0 %v1014_v52  ;;  %v1009_v53 = vpop.f32.mrb[0].mxu1  ;;  %v1957_v51 = vcombine.low %v3646_v24, %v3656_v28  ;;  %v1955_v52 = vld [vmem:[%s3892_s2 + $0x30] sm:$0xff] }
 0x114   :  { %v3184_v54 = vpop.f32.mrb[1].mxu1  ;;  %v1017_v55 = vsel %vm1013_vm2, %v1009_v53, -inf  ;;  %v1967_v24 = vand.u32 4294901760, %v1955_v52 }
 0x115   :  { %v3758_v54 = vsub.f32 %v1953_v47, %v1961_v49 }
 0x117   :  { %1018 = vmax.xlane.f32.xlu0 %v1017_v55 }
 0x1a0   :  { %v1016_v56 = vpop.xlane.xlu0 %1015 }
 0x1a1   :  { %v1020_v57 = vsub.f32 %v557_v50, %v1016_v56  ;;  %v1964_v50 = vand.u32 4294901760, %v1954_v48  ;;  %v1958_v56 = vsel %vm108_vm1, %v1957_v51, 0 }
 0x1a3   :  { %v1022_v58 = vmul.f32 1.442695, %v1020_v57  ;;  %v3762_v55 = vsub.f32 %v1954_v48, %v1964_v50  ;;  %v3766_v57 = vand.u32 4294901760, %v1958_v56 }
 0x1a4   :  { %v1019_v59 = vpop.xlane.xlu0 %1018 }
 0x1a5   :  { %3506 = vpow2.f32 %v1022_v58  ;;  %v1021_v60 = vsub.f32 %v1009_v53, %v1019_v59  ;;  %v1956_v53 = vld [vmem:[%s3892_s2 + $0x38] sm:$0xff]  ;;  %v2042_v58 = vand.u32 4294901760, %v3758_v54  ;;  %v2049_v59 = vand.u32 4294901760, %v3762_v55 }
 0x1a6   :  { %v1970_v28 = vand.u32 4294901760, %v1956_v53 }
 0x1a7   :  { %v1024_v61 = vmul.f32 1.442695, %v1021_v60  ;;  %v2055_v60 = vsub.f32 %v1955_v52, %v1967_v24 }
 0x1a9   :  { %3508 = vpow2.f32 %v1024_v61  ;;  %v2062_v61 = vsub.f32 %v1956_v53, %v1970_v28 }
 0x1af   :  { %v3507_v62 = vpop.eup %3506 }
 0x1b0   :  { %v1026_v63 = vsel %vm1013_vm2, %v3507_v62, 0.0 }
 0x1b1   :  { %1027 = vadd.xlane.f32.xlu1 %v1026_v63  ;;  %v2043_v63 = vsub.f32 %v3758_v54, %v2042_v58 }
 0x1b3   :  { %v3509_v0 = vpop.eup %3508 }
 0x1b4   :  { %v1029_v2 = vsel %vm1013_vm2, %v3509_v0, 0.0 }
 0x1b5   :  { %1030 = vadd.xlane.f32.xlu1 %v1029_v2  ;;  %v2056_v2 = vand.u32 4294901760, %v2055_v60 }
 0x23e   :  { %v1028_v5 = vpop.xlane.xlu1 %1027 }
 0x23f   :  { %3510 = vrcp.f32 %v1028_v5 }
 0x242   :  { %v1031_v6 = vpop.xlane.xlu1 %1030 }
 0x243   :  { %3512 = vrcp.f32 %v1031_v6 }
 0x249   :  { %v3511_v7 = vpop.eup %3510 }
 0x24a   :  { %v1034_v8 = vmul.f32 %v3511_v7, %v1028_v5 }
 0x24c   :  { %v1036_v9 = vsub.f32 2.0, %v1034_v8 }
 0x24d   :  { %v3513_v10 = vpop.eup %3512 }
 0x24e   :  { %v1038_v11 = vmul.f32 %v3511_v7, %v1036_v9  ;;  %v1035_v13 = vmul.f32 %v3513_v10, %v1031_v6  ;;  %v3378_v7 = vpack.c.bf16 %v1964_v50, %v1961_v49 }
 0x250   :  { %v1040_v14 = vmul.f32 %v1038_v11, %v1028_v5  ;;  %v1037_v15 = vsub.f32 2.0, %v1035_v13  ;;  %v2063_v5 = vand.u32 4294901760, %v2062_v61 }
 0x252   :  { %v1042_v17 = vsub.f32 2.0, %v1040_v14  ;;  %v1039_v18 = vmul.f32 %v3513_v10, %v1037_v15  ;;  %v2057_v10 = vsub.f32 %v2055_v60, %v2056_v2 }
 0x254   :  { %v1044_v19 = vmul.f32 %v1042_v17, %v1038_v11  ;;  %v1041_v20 = vmul.f32 %v1039_v18, %v1031_v6  ;;  %v3574_v6 = vmov 0.0|0.0   ;;  %v2064_v11 = vsub.f32 %v2062_v61, %v2063_v5 }
 0x255   :  { %v2058_v15 = vand.u32 4294901760, %v2057_v10 }
 0x256   :  { %v1046_v25 = vmul.f32 %v3507_v62, %v1044_v19  ;;  %v1043_v26 = vsub.f32 2.0, %v1041_v20  ;;  %v2030_v62 = vsub.f32 %v1958_v56, %v3766_v57  ;;  %v2065_v17 = vand.u32 4294901760, %v2064_v11 }
 0x257   :  { %v3390_v20 = vpack.c.bf16 %v3762_v55, %v3758_v54 }
 0x258   :  { %1048 = vst.msk [vmem:[#allocation4] sm:$0xf] %vm1013_vm2, %v1046_v25  ;;  %v1052_v27 = vsel %vm1050_vm3, %v1046_v25, 0  ;;  %v1045_v29 = vmul.f32 %v1043_v26, %v1039_v18  ;;  %v2031_v8 = vand.u32 4294901760, %v2030_v62  ;;  %v3381_v18 = vpack.c.bf16 %v1970_v28, %v1967_v24 }
 0x259   :  { %v3715_v32 = vand.u32 4294901760, %v1052_v27  ;;  %v3387_v19 = vpack.c.bf16 %v2065_v17, %v2058_v15  ;;  %v3402_v25 = vpack.c.bf16 %v2049_v59, %v2042_v58  ;;  %v3405_v26 = vpack.c.bf16 %v2063_v5, %v2056_v2 }
 0x25a   :  { %v1047_v33 = vmul.f32 %v3509_v0, %v1045_v29  ;;  %v2050_v0 = vsub.f32 %v3762_v55, %v2049_v59  ;;  %v2032_v13 = vsub.f32 %v2030_v62, %v2031_v8  ;;  %v1950_v29 = vld [vmem:[%s3892_s2 + $0x8] sm:$0xff] }
 0x25b   :  { %v1121_v34 = vsub.f32 %v1052_v27, %v3715_v32  ;;  %v1949_v27 = vld [vmem:[%s3892_s2] sm:$0xff] }
 0x25c   :  { %1049 = vst.msk [vmem:[#allocation4 + $0x4] sm:$0xf] %vm1013_vm2, %v1047_v33  ;;  %v1501_v35 = vsel %vm1050_vm3, %v1047_v33, 0  ;;  %v2051_v9 = vand.u32 4294901760, %v2050_v0 }
 0x25d   :  { %v3719_v37 = vand.u32 4294901760, %v1501_v35  ;;  %v1122_v38 = vand.u32 4294901760, %v1121_v34 }
 0x25f   :  { %v1570_v39 = vsub.f32 %v1501_v35, %v3719_v37  ;;  %v1123_v40 = vsub.f32 %v1121_v34, %v1122_v38  ;;  %v1952_v35 = vld [vmem:[%s3892_s2 + $0x18] sm:$0xff] }
 0x261   :  { %v1124_v43 = vand.u32 4294901760, %v1123_v40  ;;  %v1571_v23 = vand.u32 4294901760, %v1570_v39 }
 0x263   :  { %3188 = vmatmul.mubr.f32.vlgmr.msra.gmra.mrb[2].mxu0 %v1124_v43  ;;  %v1572_v44 = vsub.f32 %v1570_v39, %v1571_v23 }
 0x264   :  { %3191 = vmatpush3.msra.mxu0 %v1135_v41  ;;  %3192 = vmatprep.mubr.msk.f32.mxu0 %vm3573_vm0, %v3570_v1 }
 0x265   :  { %v1573_v46 = vand.u32 4294901760, %v1572_v44  ;;  %3195 = vmatprep.subr.mxu0 %v3570_v1 }
 0x267   :  { %3218 = vmatmul.mubr.f32.vlgmr.msra.gmra.mrb[2].mxu1 %v1573_v46 }
 0x268   :  { %3221 = vmatpush3.msra.mxu1 %v1584_v45  ;;  %3222 = vmatprep.mubr.msk.f32.mxu1 %vm3573_vm0, %v3570_v1 }
 0x269   :  { %3225 = vmatprep.subr.mxu1 %v3570_v1 }
 0x26b   :  { %3193 = vmatmul.mubr.f32.vlgmr.msra.gmra.mrb[2].mxu0 %v3715_v32 }
 0x26c   :  { %3196 = vmatpush3.msra.mxu0 %v1132_v21  ;;  %3197 = vmatprep.mubr.msk.f32.mxu0 %vm3573_vm0, %v3570_v1  ;;  %v3393_v21 = vpack.c.bf16 %v2062_v61, %v2055_v60 }
 0x26d   :  { %3200 = vmatprep.subr.mxu0 %v3570_v1 }
 0x26f   :  { %3223 = vmatmul.mubr.f32.vlgmr.msra.gmra.mrb[2].mxu1 %v3719_v37 }
 0x270   :  { %3226 = vmatpush3.msra.mxu1 %v1581_v31  ;;  %3227 = vmatprep.mubr.msk.f32.mxu1 %vm3573_vm0, %v3570_v1  ;;  %v2454_v31 = vand.u32 4294901760, %v1950_v29 }
 0x271   :  { %3230 = vmatprep.subr.mxu1 %v3570_v1 }
 0x272   :  { %v2538_v33 = vsub.f32 %v1950_v29, %v2454_v31 }
 0x273   :  { %3198 = vmatmul.mubr.f32.vlgmr.msra.gmra.mrb[2].mxu0 %v1121_v34  ;;  %v1951_v34 = vld [vmem:[%s3892_s2 + $0x10] sm:$0xff]  ;;  %s3575_s2 = smov [#allocation4]  }
 0x274   :  { %3201 = vmatpush3.msra.mxu0 %v3701_v3  ;;  %3202 = vmatprep.mubr.msk.f32.mxu0 %vm3573_vm0, %v3570_v1  ;;  %s3001_s19 = sshll.u32 %s3575_s2, 4  ;;  %s3002_s19 = int_to_ptr.vmem [resolvable:$true] %s3001_s19 }
 0x275   :  { %3205 = vmatprep.subr.mxu0 %v3570_v1  ;;  %s3522_s20 = scalar_lea.vmem %s3002_s19, 128  ;;  %p3527_p1 = scmp.lt.s32.totalorder %s3002_s19, %s3002_s19 }
 0x276   :  { %p3523_p0 = scmp.ne.s32.totalorder %s3002_s19, %s3522_s20  ;;  %p3528_p2 = scmp.lt.s32.totalorder %s3522_s20, %s3522_s20 }
 0x277   :  { %3228 = vmatmul.mubr.f32.vlgmr.msra.gmra.mrb[2].mxu1 %v1570_v39 }
 0x278   :  { %3231 = vmatpush3.msra.mxu1 %v3706_v4  ;;  %3232 = vmatprep.mubr.msk.f32.mxu1 %vm3573_vm0, %v3570_v1  ;;  %p3529_p3 = por %p3528_p2, %p3527_p1 }
 0x279   :  { %3235 = vmatprep.subr.mxu1 %v3570_v1 }
 0x27a   :  { %p3530_p4 = pnand %p3529_p3, %p3523_p0 }
 0x27b   :  { %3203 = vmatmul.mubr.f32.vlgmr.msra.gmra.mrb[2].mxu0 %v1122_v38  ;;  %v2460_v38 = vand.u32 4294901760, %v1952_v35 }
 0x27c   :  { %3206 = vmatpush3.msra.mxu0 %v1133_v30  ;;  %3207 = vmatprep.mubr.msk.f32.mxu0 %vm3573_vm0, %v3570_v1  ;;  %v2451_v30 = vand.u32 4294901760, %v1949_v27 }
 0x27d   :  { %3210 = vmatprep.subr.mxu0 %v3570_v1  ;;  %v2552_v42 = vsub.f32 %v1952_v35, %v2460_v38 }
 0x27e   :  { %v3414_v52 = vpack.c.bf16 %v2454_v31, %v2451_v30 }
 0x27f   :  { %3233 = vmatmul.mubr.f32.vlgmr.msra.gmra.mrb[2].mxu1 %v1571_v23  ;;  %v2553_v45 = vand.u32 4294901760, %v2552_v42 }
 0x280   :  { %3236 = vmatpush3.msra.mxu1 %v1582_v36  ;;  %3237 = vmatprep.mubr.msk.f32.mxu1 %vm3573_vm0, %v3570_v1  ;;  %v2539_v36 = vand.u32 4294901760, %v2538_v33 }
 0x281   :  { %3240 = vmatprep.subr.mxu1 %v3570_v1  ;;  %v2554_v48 = vsub.f32 %v2552_v42, %v2553_v45 }
 0x282   :  { %v2540_v40 = vsub.f32 %v2538_v33, %v2539_v36 }
 0x283   :  { %3208 = vmatmul.mubr.f32.vlgmr.msra.gmra.mrb[2].mxu0 %v3715_v32  ;;  %v2555_v50 = vand.u32 4294901760, %v2554_v48 }
 0x284   :  { %3211 = vmatpush3.msra.mxu0 %v3701_v3  ;;  %3212 = vmatprep.mubr.msk.f32.mxu0 %vm3573_vm0, %v3570_v1  ;;  %v2044_v3 = vand.u32 4294901760, %v2043_v63  ;;  %v2541_v23 = vand.u32 4294901760, %v2540_v40 }
 0x285   :  { %3377 = vmatprep.subr.bf16.mxu0 %v3574_v6 }
 0x286   :  { %v3384_v14 = vpack.c.bf16 %v2051_v9, %v2044_v3 }
 0x287   :  { %3238 = vmatmul.mubr.f32.vlgmr.msra.gmra.mrb[2].mxu1 %v3719_v37 }
 0x288   :  { %3241 = vmatpush3.msra.mxu1 %v3706_v4  ;;  %3242 = vmatprep.mubr.msk.f32.mxu1 %vm3573_vm0, %v3570_v1  ;;  %v2033_v4 = vand.u32 4294901760, %v2032_v13 }
 0x289   :  { %3383 = vmatprep.subr.bf16.mxu1 %v3574_v6 }
 0x28b   :  { %3213 = vmatmul.mubr.f32.vlgmr.msra.gmra.mrb[2].mxu0 %v3715_v32  ;;  %v3827_v32 = vsub.f32 %v1949_v27, %v2451_v30 }
 0x28c   :  { %3379 = vmatpush3.bf16.msra.mxu0 %v3378_v7  ;;  %3253 = vmatprep.mubr.msk.f32.mxu0 %vm3573_vm0, %v3570_v1 }
 0x28d   :  { %3380 = vmatprep.subr.bf16.mxu0 %v3574_v6  ;;  %v2532_v22 = vand.u32 4294901760, %v3827_v32  ;;  %v3426_v54 = vpack.c.bf16 %v2538_v33, %v3827_v32 }
 0x28f   :  { %3243 = vmatmul.mubr.f32.vlgmr.msra.gmra.mrb[2].mxu1 %v3719_v37  ;;  %v2457_v37 = vand.u32 4294901760, %v1951_v34  ;;  %v2533_v39 = vsub.f32 %v3827_v32, %v2532_v22  ;;  %v3438_v24 = vpack.c.bf16 %v2539_v36, %v2532_v22 }
 0x290   :  { %3385 = vmatpush3.bf16.msra.mxu1 %v3384_v14  ;;  %3382 = vmatpush3.bf16.msra.mxu0 %v3381_v18 }
 0x291   :  { %3386 = vmatprep.subr.bf16.mxu1 %v3574_v6  ;;  %3264 = vmatprep.mubr.msk.f32.mxu1 %vm3573_vm0, %v3570_v1  ;;  %v2545_v41 = vsub.f32 %v1951_v34, %v2457_v37  ;;  %v2534_v43 = vand.u32 4294901760, %v2533_v39  ;;  %v3417_v53 = vpack.c.bf16 %v2460_v38, %v2457_v37 }
 0x292   :  { %3389 = vmatprep.subr.bf16.mxu0 %v3574_v6 }
 0x293   :  { %3254 = vmatmul.mubr.f32.vlgmr.msra.gmra.mrb[4].mxu0 %v2033_v4  ;;  %v2546_v44 = vand.u32 4294901760, %v2545_v41  ;;  %v3420_v46 = vpack.c.bf16 %v2541_v23, %v2534_v43  ;;  %v3429_v55 = vpack.c.bf16 %v2552_v42, %v2545_v41 }
 0x294   :  { %3388 = vmatpush3.bf16.msra.mxu1 %v3387_v19  ;;  %3391 = vmatpush3.bf16.msra.mxu0 %v3390_v20 }
 0x295   :  { %3395 = vmatprep.subr.bf16.mxu1 %v3574_v6  ;;  %3392 = vmatprep.subr.bf16.mxu0 %v3574_v6  ;;  %v2547_v47 = vsub.f32 %v2545_v41, %v2546_v44  ;;  %v3441_v28 = vpack.c.bf16 %v2553_v45, %v2546_v44 }
 0x296   :  { %3275 = vmatprep.mubr.msk.f32.mxu0 %vm3573_vm0, %v3570_v1 }
 0x297   :  { %3265 = vmatmul.mubr.f32.vlgmr.msra.gmra.mrb[4].mxu1 %v3766_v57  ;;  %v2548_v49 = vand.u32 4294901760, %v2547_v47 }
 0x298   :  { %3397 = vmatpush3.bf16.msra.mxu1 %v3378_v7  ;;  %3394 = vmatpush3.bf16.msra.mxu0 %v3393_v21 }
 0x299   :  { %3398 = vmatprep.subr.bf16.mxu1 %v3574_v6  ;;  %3286 = vmatprep.mubr.msk.f32.mxu1 %vm3573_vm0, %v3570_v1  ;;  %v3423_v51 = vpack.c.bf16 %v2555_v50, %v2548_v49 }
 0x29a   :  { %3401 = vmatprep.subr.bf16.mxu0 %v3574_v6 }
 0x29b   :  { %3276 = vmatmul.mubr.f32.vlgmr.msra.gmra.mrb[6].mxu0 %v2030_v62 }
 0x29c   :  { %3400 = vmatpush3.bf16.msra.mxu1 %v3381_v18  ;;  %3403 = vmatpush3.bf16.msra.mxu0 %v3402_v25 }
 0x29d   :  { %3407 = vmatprep.subr.bf16.mxu1 %v3574_v6  ;;  %3404 = vmatprep.subr.bf16.mxu0 %v3574_v6 }
 0x29e   :  { %3297 = vmatprep.mubr.msk.f32.mxu0 %vm3573_vm0, %v3570_v1 }
 0x29f   :  { %3287 = vmatmul.mubr.f32.vlgmr.msra.gmra.mrb[6].mxu1 %v2031_v8 }
 0x2a0   :  { %3409 = vmatpush3.bf16.msra.mxu1 %v3378_v7  ;;  %3406 = vmatpush3.bf16.msra.mxu0 %v3405_v26 }
 0x2a1   :  { %3410 = vmatprep.subr.bf16.mxu1 %v3574_v6  ;;  %3308 = vmatprep.mubr.msk.f32.mxu1 %vm3573_vm0, %v3570_v1 }
 0x2a2   :  { %3413 = vmatprep.subr.bf16.mxu0 %v3574_v6 }
 0x2a3   :  { %3298 = vmatmul.mubr.f32.vlgmr.msra.gmra.mrb[8].mxu0 %v3766_v57 }
 0x2a4   :  { %3412 = vmatpush3.bf16.msra.mxu1 %v3381_v18  ;;  %3319 = vmatprep.mubr.msk.f32.mxu0 %vm3573_vm0, %v3570_v1 }
 0x2a5   :  { %3419 = vmatprep.subr.bf16.mxu1 %v3574_v6  ;;  %3415 = vmatpush3.bf16.msra.mxu0 %v3414_v52 }
 0x2a6   :  { %3416 = vmatprep.subr.bf16.mxu0 %v3574_v6 }
 0x2a7   :  { %3309 = vmatmul.mubr.f32.vlgmr.msra.gmra.mrb[8].mxu1 %v3766_v57 }
 0x2a8   :  { %3330 = vmatprep.mubr.msk.f32.mxu1 %vm3573_vm0, %v3570_v1  ;;  %3421 = vmatpush3.bf16.msra.mxu1 %v3420_v46 }
 0x2a9   :  { %3422 = vmatprep.subr.bf16.mxu1 %v3574_v6  ;;  %3418 = vmatpush3.bf16.msra.mxu0 %v3417_v53 }
 0x2aa   :  { %3425 = vmatprep.subr.bf16.mxu0 %v3574_v6 }
 0x2ac   :  { %3424 = vmatpush3.bf16.msra.mxu1 %v3423_v51 }
 0x2ad   :  { %3431 = vmatprep.subr.bf16.mxu1 %v3574_v6 }
 0x35e   :  { %v1496_v56 = vpop.f32.mrb[2].mxu0 }
 0x35f   :  { %v3214_v57 = vpop.f32.mrb[3].mxu0 }
 0x362   :  { %v1945_v58 = vpop.f32.mrb[2].mxu1 }
 0x363   :  { %v2447_v59 = vcombine.low %v1496_v56, %v1945_v58  ;;  %v3244_v60 = vpop.f32.mrb[3].mxu1 }
 0x365   :  { %v2448_v61 = vsel %vm108_vm1, %v2447_v59, 0 }
 0x366   :  { %v2519_v62 = vand.u32 4294901760, %v2448_v61  ;;  %v2035_v63 = vpop.f32.mrb[4].mxu0 }
 0x367   :  { %v3255_v0 = vpop.f32.mrb[5].mxu0 }
 0x368   :  { %v2520_v2 = vsub.f32 %v2448_v61, %v2519_v62  ;;  %3331 = vmatmul.mubr.f32.vlgmr.msra.gmra.mrb[10].mxu1 %v2519_v62 }
 0x369   :  { %3433 = vmatpush3.bf16.msra.mxu1 %v3414_v52  ;;  %3352 = vmatprep.mubr.msk.f32.mxu1 %vm3573_vm0, %v3570_v1 }
 0x36a   :  { %3434 = vmatprep.subr.bf16.mxu1 %v3574_v6  ;;  %v2521_v5 = vand.u32 4294901760, %v2520_v2  ;;  %v2126_v7 = vpop.f32.mrb[4].mxu1 }
 0x36b   :  { %v2127_v8 = vadd.f32 %v2126_v7, %v2035_v63  ;;  %v3266_v3 = vpop.f32.mrb[5].mxu1 }
 0x36c   :  { %v2522_v9 = vsub.f32 %v2520_v2, %v2521_v5 }
 0x36d   :  { %3436 = vmatpush3.bf16.msra.mxu1 %v3417_v53 }
 0x36e   :  { %3443 = vmatprep.subr.bf16.mxu1 %v3574_v6  ;;  %v2523_v10 = vand.u32 4294901760, %v2522_v9  ;;  %v2206_v11 = vpop.f32.mrb[6].mxu0 }
 0x36f   :  { %v2207_v13 = vadd.f32 %v2206_v11, %v2127_v8  ;;  %v3277_v14 = vpop.f32.mrb[7].mxu0 }
 0x370   :  { %3353 = vmatmul.mubr.f32.vlgmr.msra.gmra.mrb[12].mxu1 %v2521_v5  ;;  %3320 = vmatmul.mubr.f32.vlgmr.msra.gmra.mrb[10].mxu0 %v2523_v10 }
 0x371   :  { %3427 = vmatpush3.bf16.msra.mxu0 %v3426_v54  ;;  %3445 = vmatpush3.bf16.msra.mxu1 %v3414_v52 }
 0x372   :  { %3428 = vmatprep.subr.bf16.mxu0 %v3574_v6  ;;  %3446 = vmatprep.subr.bf16.mxu1 %v3574_v6  ;;  %v2283_v15 = vpop.f32.mrb[6].mxu1 }
 0x373   :  { %3341 = vmatprep.mubr.msk.f32.mxu0 %vm3573_vm0, %v3570_v1  ;;  %3374 = vmatprep.mubr.msk.f32.mxu1 %vm3573_vm0, %v3570_v1  ;;  %v2284_v17 = vadd.f32 %v2283_v15, %v2207_v13  ;;  %v3288_v18 = vpop.f32.mrb[7].mxu1 }
 0x375   :  { %3430 = vmatpush3.bf16.msra.mxu0 %v3429_v55  ;;  %3448 = vmatpush3.bf16.msra.mxu1 %v3417_v53 }
 0x376   :  { %3437 = vmatprep.subr.bf16.mxu0 %v3574_v6  ;;  %v2366_v4 = vpop.f32.mrb[8].mxu0 }
 0x377   :  { %v2367_v19 = vadd.f32 %v2366_v4, %v2284_v17  ;;  %v3299_v20 = vpop.f32.mrb[9].mxu0 }
 0x378   :  { %3342 = vmatmul.mubr.f32.vlgmr.msra.gmra.mrb[12].mxu0 %v2520_v2  ;;  %3375 = vmatmul.mubr.f32.vlgmr.msra.gmra.mrb[14].mxu1 %v2519_v62 }
 0x379   :  { %3439 = vmatpush3.bf16.msra.mxu0 %v3438_v24  ;;  %3363 = vmatprep.mubr.msk.f32.mxu0 %vm3573_vm0, %v3570_v1 }
 0x37a   :  { %3440 = vmatprep.subr.bf16.mxu0 %v3574_v6  ;;  %v2441_v21 = vpop.f32.mrb[8].mxu1 }
 0x37b   :  { %v2442_v25 = vadd.f32 %v2441_v21, %v2367_v19  ;;  %v3310_v26 = vpop.f32.mrb[9].mxu1 }
 0x37d   :  { %3442 = vmatpush3.bf16.msra.mxu0 %v3441_v28 }
 0x380   :  { %3364 = vmatmul.mubr.f32.vlgmr.msra.gmra.mrb[14].mxu0 %v2519_v62 }
 0x381   :  { %3533 = shalt.err (!%p3530_p4)
}
 0x382   :  { %s3534_s23 = scalar_lea.hbm %s3895_s5, 128 }
 0x383   :  { %p3535_p5 = scmp.ne.s32.totalorder %s3895_s5, %s3534_s23  ;;  %p3538_p6 = scmp.lt.u32.totalorder %s3534_s23, %s3895_s5 }
 0x385   :  { %p3540_p7 = pnand %p3538_p6, %p3535_p5 }
 0x387   :  { %3543 = shalt.err (!%p3540_p7)
}
 0x388   :  { %s3576_s28 = smov 64   ;;  %s3577_s29 = smov 4   ;;  %v3016_v43 = vld [vmem:[%s3893_s3] ss:$0 sm:$0xff]  ;;  %vm2979_vm4 = vcmask 254976  }
 0x389   :  { %3007 = dma.vmem_to_hbm [thread:$0]  %s3002_s19, 128, %s3895_s5, [#allocation5], %s3576_s28, %s3576_s28, %s3577_s29  }
 0x38a   :  { %s3578_s5 = smov [#allocation2]  }
 0x38b   :  { %s2989_s7 = sshll.u32 %s3578_s5, 4  ;;  %s2990_s7 = int_to_ptr.vmem [resolvable:$true] %s2989_s7 }
 0x38c   :  { %s3544_s3 = scalar_lea.vmem %s2990_s7, 128  ;;  %p3549_p9 = scmp.lt.s32.totalorder %s2990_s7, %s2990_s7 }
 0x38d   :  { %p3545_p8 = scmp.ne.s32.totalorder %s2990_s7, %s3544_s3  ;;  %p3550_p10 = scmp.lt.s32.totalorder %s3544_s3, %s3544_s3 }
 0x38f   :  { %p3551_p11 = por %p3550_p10, %p3549_p9 }
 0x391   :  { %p3552_p12 = pnand %p3551_p11, %p3545_p8 }
 0x43b   :  { %v2616_v6 = vpop.f32.mrb[10].mxu1 }
 0x43c   :  { %v3332_v27 = vpop.f32.mrb[11].mxu1 }
 0x443   :  { %v2773_v29 = vpop.f32.mrb[12].mxu1  ;;  %v2525_v30 = vpop.f32.mrb[10].mxu0 }
 0x444   :  { %v2526_v31 = vadd.f32 %v2525_v30, %v2442_v25  ;;  %v3354_v32 = vpop.f32.mrb[13].mxu1  ;;  %v3321_v33 = vpop.f32.mrb[11].mxu0 }
 0x446   :  { %v2617_v34 = vadd.f32 %v2616_v6, %v2526_v31 }
 0x44b   :  { %v2696_v35 = vpop.f32.mrb[12].mxu0  ;;  %v2931_v22 = vpop.f32.mrb[14].mxu1 }
 0x44c   :  { %v2697_v36 = vadd.f32 %v2696_v35, %v2617_v34  ;;  %v3343_v37 = vpop.f32.mrb[13].mxu0  ;;  %v3376_v38 = vpop.f32.mrb[15].mxu1 }
 0x44e   :  { %v2774_v39 = vadd.f32 %v2773_v29, %v2697_v36 }
 0x453   :  { %v2856_v40 = vpop.f32.mrb[14].mxu0 }
 0x454   :  { %v2857_v41 = vadd.f32 %v2856_v40, %v2774_v39  ;;  %v3365_v42 = vpop.f32.mrb[15].mxu0 }
 0x456   :  { %v2932_v23 = vadd.f32 %v2931_v22, %v2857_v41 }
 0x458   :  { %v2942_v44 = vadd.f32 %v3016_v43, %v2932_v23 }
 0x45a   :  { %3514 = vtanh.f32 %v2942_v44 }
 0x464   :  { %v3515_v45 = vpop.eup %3514 }
 0x465   :  { %v2945_v46 = vcombine.high %v3515_v45, %v3515_v45  ;;  %v2952_v47 = vrot.slane %v3515_v45, %v3622_v12 }
 0x467   :  { %v2960_v48 = vrot.slane %v2945_v46, %v3622_v12 }
 0x469   :  { %v2961_v49 = vcombine.low %v2952_v47, %v2960_v48  ;;  %v2962_v50 = vcombine.high %v2952_v47, %v2960_v48 }
 0x46b   :  { %v2969_v51 = vrot.slane %v2961_v49, %v3637_v16  ;;  %v2976_v52 = vrot.slane %v2962_v50, %v3637_v16 }
 0x46d   :  { %v2977_v53 = vcombine.high %v2969_v51, %v3570_v1  ;;  %v2978_v54 = vcombine.high %v2976_v52, %v3570_v1  ;;  %2980 = vst.msk [vmem:[#allocation2] sm:$0x3] %vm2979_vm4, %v2969_v51  ;;  %2982 = vst.msk [vmem:[#allocation2 + $0x4] sm:$0x3] %vm2979_vm4, %v2976_v52 }
 0x46f   :  { %2981 = vst.msk [vmem:[#allocation2 + $0x2] sm:$0x3] %vm2979_vm4, %v2977_v53  ;;  %2983 = vst.msk [vmem:[#allocation2 + $0x6] sm:$0x3] %vm2979_vm4, %v2978_v54 }
 0x470   :  { %3555 = shalt.err (!%p3552_p12)
}
 0x471   :  { %s3556_s10 = scalar_lea.hbm %s3894_s4, 128 }
 0x472   :  { %p3557_p13 = scmp.ne.s32.totalorder %s3894_s4, %s3556_s10  ;;  %p3560_p0 = scmp.lt.u32.totalorder %s3556_s10, %s3894_s4 }
 0x474   :  { %p3562_p1 = pnand %p3560_p0, %p3557_p13 }
 0x476   :  { %3565 = shalt.err (!%p3562_p1)
}
 0x477   :  { %s3579_s15 = smov 32   ;;  %s3580_s16 = smov 2  }
 0x478   :  { %2995 = dma.vmem_to_hbm [thread:$0]  %s2990_s7, 128, %s3894_s4, [#allocation3], %s3579_s15, %s3579_s15, %s3580_s16  }
 0x479   :  { %3566 = dma.done.wait [#allocation3], 128  }
 0x47a   :  { %3567 = vsyncadd [#allocation3], 4294967168 }
 0x47b   :  { %3568 = dma.done.wait [#allocation5], 128  }
 0x47c   :  { %3569 = vsyncadd [#allocation5], 4294967168 }
 0x47d   :  { %3014 = vsyncpa [#allocation3], 1 }
 0x47e   :  { %3015 = vsyncpa [#allocation5], 1 }

</bundles_post_ra>
